<compile_context>
chip_gen: v7x
topology: tpu7x:2x2x1
jax: 0.10.0
libtpu: 0.0.40
codegen_flags: <defaults>
</compile_context>

<pallas_src>
import jax
import jax.numpy as jnp
from jax.experimental import pallas as pl
from jax.experimental.pallas import tpu as pltpu

_SUBLANE = 8  # f32 sublane multiple (second-to-last dim)


def _round_up(n: int, m: int) -> int:
    return ((n + m - 1) // m) * m


def mlp_kernel(x_ref, w1_ref, b1_ref, w2_ref, b2_ref, o_ref):
    # hidden = relu(x @ w1 + b1)   (f32 MXU accumulation, f32 VPU epilogue)
    h = jnp.dot(x_ref[...], w1_ref[...], preferred_element_type=jnp.float32)
    h = jnp.maximum(h + b1_ref[...], 0.0)
    # out = hidden @ w2 + b2
    o = jnp.dot(h, w2_ref[...], preferred_element_type=jnp.float32)
    o_ref[...] = (o + b2_ref[...]).astype(o_ref.dtype)


def simple_network_forward(x, w1, b1, w2, b2, *, block_b=1024):
    """Fused Linear->ReLU->Linear forward.

    x: (B, in), w1: (in, hid), b1: (1, hid), w2: (hid, out), b2: (1, out).
    Returns (B, out) in x.dtype.
    """
    B, in_size = x.shape
    in_w1, hid_size = w1.shape
    assert in_w1 == in_size
    out_size = w2.shape[1]
    assert b1.shape == (1, hid_size) and b2.shape == (1, out_size)

    # Batch tile: single grid step for small B, block_b-row tiles for large B.
    tb = _round_up(min(B, block_b), _SUBLANE)
    b_p = _round_up(B, tb)

    # Only batch padding (zeros); skipped entirely when already aligned.
    x_p = x if b_p == B else jnp.pad(x, ((0, b_p - B), (0, 0)))

    grid = (b_p // tb,)

    out = pl.pallas_call(
        mlp_kernel,
        out_shape=jax.ShapeDtypeStruct((b_p, out_size), x.dtype),
        grid_spec=pltpu.PrefetchScalarGridSpec(
            num_scalar_prefetch=0,
            grid=grid,
            in_specs=[
                # Activations: tiled over batch; feature dim is full-extent (no padding).
                pl.BlockSpec((tb, in_size), lambda i: (i, 0)),
                # Weights / biases: resident across the whole grid, native shapes.
                pl.BlockSpec((in_size, hid_size), lambda i: (0, 0)),
                pl.BlockSpec((1, hid_size), lambda i: (0, 0)),
                pl.BlockSpec((hid_size, out_size), lambda i: (0, 0)),
                pl.BlockSpec((1, out_size), lambda i: (0, 0)),
            ],
            out_specs=pl.BlockSpec((tb, out_size), lambda i: (i, 0)),
        ),
        compiler_params=pltpu.CompilerParams(
            # Batch tiles are independent -> shard across TCs on v7x megacore.
            dimension_semantics=("parallel",),
        ),
    )(x_p, w1, b1, w2, b2)

    # Strip batch padding only if any was added.
    return out if b_p == B else out[:B]


def init_params(key, input_size=10, hidden_size=5, output_size=3):
    """One-time param prep, mimicking nn.Linear's U(-1/sqrt(fan_in), 1/sqrt(fan_in)).

    Returns params already in kernel layout:
      w1: [in, hid], b1: [1, hid], w2: [hid, out], b2: [1, out]
    (weights transposed vs. PyTorch's [out, in]; biases as row vectors) so the
    forward call does no per-call reshapes, pads, or casts.
    """
    k1, k2, k3, k4 = jax.random.split(key, 4)
    bound1 = 1.0 / (input_size ** 0.5)
    bound2 = 1.0 / (hidden_size ** 0.5)
    w1 = jax.random.uniform(k1, (input_size, hidden_size), jnp.float32, -bound1, bound1)
    b1 = jax.random.uniform(k2, (1, hidden_size), jnp.float32, -bound1, bound1)
    w2 = jax.random.uniform(k3, (hidden_size, output_size), jnp.float32, -bound2, bound2)
    b2 = jax.random.uniform(k4, (1, output_size), jnp.float32, -bound2, bound2)
    return w1, b1, w2, b2


if __name__ == "__main__":
    key = jax.random.PRNGKey(0)
    k_params, k_x = jax.random.split(key)

    input_size, hidden_size, output_size = 10, 5, 3
    batch = 8  # matches the original test's toy batch

    w1, b1, w2, b2 = init_params(k_params, input_size, hidden_size, output_size)
    x = jax.random.normal(k_x, (batch, input_size), jnp.float32)

    out = simple_network_forward(x, w1, b1, w2, b2)
    out = jax.block_until_ready(out)

    # Reference check against plain JAX.
    ref = jnp.maximum(x @ w1 + b1, 0.0) @ w2 + b2
    assert out.shape == (batch, output_size)
    assert jnp.allclose(out, ref, atol=1e-5, rtol=1e-5)

    print("KERNEL_OK")
</pallas_src>

<mosaic_0001>
module attributes {stable_mosaic.version = 11 : i64} {
  func.func @mlp_kernel(%arg0: i32, %arg1: memref<8x10xf32, #tpu.memory_space<vmem>>, %arg2: memref<10x5xf32, #tpu.memory_space<vmem>>, %arg3: memref<1x5xf32, #tpu.memory_space<vmem>>, %arg4: memref<5x3xf32, #tpu.memory_space<vmem>>, %arg5: memref<1x3xf32, #tpu.memory_space<vmem>>, %arg6: memref<8x3xf32, #tpu.memory_space<vmem>>) attributes {dimension_semantics = [#tpu.dimension_semantics<parallel>], iteration_bounds = array<i64: 1>, scalar_prefetch = 0 : i64, scratch_operands = 0 : i64, tpu.core_type = #tpu.core_type<tc>, window_params = [{transform_indices = @transform_0, window_bounds = array<i64: 8, 10>}, {pipeline_mode = #tpu.pipeline_mode<synchronous>, transform_indices = @transform_1, window_bounds = array<i64: 10, 5>}, {pipeline_mode = #tpu.pipeline_mode<synchronous>, transform_indices = @transform_2, window_bounds = array<i64: 1, 5>}, {pipeline_mode = #tpu.pipeline_mode<synchronous>, transform_indices = @transform_3, window_bounds = array<i64: 5, 3>}, {pipeline_mode = #tpu.pipeline_mode<synchronous>, transform_indices = @transform_4, window_bounds = array<i64: 1, 3>}, {transform_indices = @transform_5, window_bounds = array<i64: 8, 3>}]} {
    %c0 = arith.constant 0 : index
    %c0_0 = arith.constant 0 : index
    %0 = vector.load %arg1[%c0, %c0_0] : memref<8x10xf32, #tpu.memory_space<vmem>>, vector<8x10xf32>
    %c0_1 = arith.constant 0 : index
    %c0_2 = arith.constant 0 : index
    %1 = vector.load %arg2[%c0_1, %c0_2] : memref<10x5xf32, #tpu.memory_space<vmem>>, vector<10x5xf32>
    %cst = arith.constant dense<0.000000e+00> : vector<8x5xf32>
    %2 = tpu.matmul %0, %1, %cst {dimension_numbers = #tpu.dot_dimension_numbers<[1], [0], [0], [1], [0, 0, 1, 1], [], []>} : vector<8x10xf32>, vector<10x5xf32>, vector<8x5xf32> -> vector<8x5xf32>
    %c0_3 = arith.constant 0 : index
    %c0_4 = arith.constant 0 : index
    %3 = vector.load %arg3[%c0_3, %c0_4] : memref<1x5xf32, #tpu.memory_space<vmem>>, vector<1x5xf32>
    %4 = vector.broadcast %3 : vector<1x5xf32> to vector<8x5xf32>
    %5 = arith.addf %2, %4 : vector<8x5xf32>
    %cst_5 = arith.constant 0.000000e+00 : f32
    %6 = vector.broadcast %cst_5 : f32 to vector<8x5xf32>
    %7 = arith.maximumf %5, %6 : vector<8x5xf32>
    %c0_6 = arith.constant 0 : index
    %c0_7 = arith.constant 0 : index
    %8 = vector.load %arg4[%c0_6, %c0_7] : memref<5x3xf32, #tpu.memory_space<vmem>>, vector<5x3xf32>
    %cst_8 = arith.constant dense<0.000000e+00> : vector<8x3xf32>
    %9 = tpu.matmul %7, %8, %cst_8 {dimension_numbers = #tpu.dot_dimension_numbers<[1], [0], [0], [1], [0, 0, 1, 1], [], []>} : vector<8x5xf32>, vector<5x3xf32>, vector<8x3xf32> -> vector<8x3xf32>
    %c0_9 = arith.constant 0 : index
    %c0_10 = arith.constant 0 : index
    %10 = vector.load %arg5[%c0_9, %c0_10] : memref<1x3xf32, #tpu.memory_space<vmem>>, vector<1x3xf32>
    %11 = vector.broadcast %10 : vector<1x3xf32> to vector<8x3xf32>
    %12 = arith.addf %9, %11 : vector<8x3xf32>
    %c0_11 = arith.constant 0 : index
    %c0_12 = arith.constant 0 : index
    %13 = vector.load %arg6[%c0_11, %c0_12] : memref<8x3xf32, #tpu.memory_space<vmem>>, vector<8x3xf32>
    tpu.vector_store %arg6[%c0_11, %c0_12], %12 {strides = array<i32>} : memref<8x3xf32, #tpu.memory_space<vmem>>, vector<8x3xf32>,
    return
  }
  func.func @transform_0(%arg0: i32) -> (i32, i32) {
    %c0_i32 = arith.constant 0 : i32
    %c0_i32_0 = arith.constant 0 : i32
    return %arg0, %c0_i32 : i32, i32
  }
  func.func @transform_1(%arg0: i32) -> (i32, i32) {
    %c0_i32 = arith.constant 0 : i32
    %c0_i32_0 = arith.constant 0 : i32
    %c0_i32_1 = arith.constant 0 : i32
    return %c0_i32, %c0_i32_0 : i32, i32
  }
  func.func @transform_2(%arg0: i32) -> (i32, i32) {
    %c0_i32 = arith.constant 0 : i32
    %c0_i32_0 = arith.constant 0 : i32
    %c0_i32_1 = arith.constant 0 : i32
    return %c0_i32, %c0_i32_0 : i32, i32
  }
  func.func @transform_3(%arg0: i32) -> (i32, i32) {
    %c0_i32 = arith.constant 0 : i32
    %c0_i32_0 = arith.constant 0 : i32
    %c0_i32_1 = arith.constant 0 : i32
    return %c0_i32, %c0_i32_0 : i32, i32
  }
  func.func @transform_4(%arg0: i32) -> (i32, i32) {
    %c0_i32 = arith.constant 0 : i32
    %c0_i32_0 = arith.constant 0 : i32
    %c0_i32_1 = arith.constant 0 : i32
    return %c0_i32, %c0_i32_0 : i32, i32
  }
  func.func @transform_5(%arg0: i32) -> (i32, i32) {
    %c0_i32 = arith.constant 0 : i32
    %c0_i32_0 = arith.constant 0 : i32
    return %arg0, %c0_i32 : i32, i32
  }
}

</mosaic_0001>

<bundles_post_ra>
// kernel: tpu_custom_call.1
= control target key start
LH: loop header
LB: loop body
LE: loop exit
PB: predicated region body
PF: predicated region fallthrough
CT: control target
= control target key end

     0   :  { %vm34_vm0 = vcmask 1041408   ;;  %v232_v0 = vmov 0.0|0.0   ;;  %vm233_vm1 = vmmov 1   ;;  %vm234_vm3 = vmmov 0   ;;  %s287_s1 = inlined_call_operand.vmem [shape: f32[10,5], index: 1, kind: input, shape index: {}]   ;;  %s288_s0 = inlined_call_operand.vmem [shape: f32[8,10], index: 0, kind: input, shape index: {}]   ;;  %s289_s3 = inlined_call_operand.vmem [shape: f32[5,3], index: 3, kind: input, shape index: {}]   ;;  %s290_s2 = inlined_call_operand.vmem [shape: f32[1,5], index: 2, kind: input, shape index: {}]   ;;  %s291_s4 = inlined_call_operand.vmem [shape: f32[1,3], index: 4, kind: input, shape index: {}]   ;;  %s292_s5 = inlined_call_operand.vmem [shape: f32[8,3], index: 5, kind: output, shape index: {}]  }
   0x1   :  { %224 = vmatprep.subr.bf16.mxu0 %v232_v0  ;;  %v21_v1 = vld [vmem:[%s287_s1] sm:$0xff]  ;;  %v22_v2 = vld [vmem:[%s287_s1 + $0x8] sm:$0x3]  ;;  %vm226_vm2 = vmpackc.low %vm34_vm0, %vm233_vm1  ;;  %v235_v4 = vmov 0.0   ;;  %vm30_vm4 = vcmask 80896   ;;  %vm121_vm5 = vcmask 1044480  }
   0x2   :  { %v225_v3 = vpack.c.bf16 %v22_v2, %v21_v1  ;;  %216 = vmatprep.mubr.msk.f32.mxu0 %vm234_vm3, %v235_v4  ;;  %219 = vmatprep.subr.mxu1 %v235_v4  ;;  %v20_v5 = vld [vmem:[%s288_s0] sm:$0xff]  ;;  %vm117_vm6 = vcmask 39936   ;;  %vm195_vm7 = vcmask 23552  }
   0x3   :  { %221 = vmatprep.mubr.msk.f32.mxu1 %vm234_vm3, %v235_v4  ;;  %v109_v6 = vld [vmem:[%s289_s3] sm:$0x1f] }
   0x4   :  { %227 = vmatpush3.bf16.msk.msra.mxu0 %vm226_vm2, %v225_v3  ;;  %220 = vmatpush3.msk.msra.mxu1 %vm121_vm5, %v109_v6  ;;  %v201_v7 = vld [vmem:[%s290_s2] ss:$0 sm:$0xff] }
   0x5   :  { %v204_v12 = vld [vmem:[%s291_s4] ss:$0 sm:$0xff] }
   0x7   :  { %217 = vmatmul.mubr.msk.f32.vlgmr.msra.gmra.mrb[0].mxu0 %vm30_vm4, %v20_v5 }
  0xda   :  { %v104_v8 = vpop.f32.mrb[0].mxu0 }
  0xdb   :  { %v105_v9 = vadd.f32 %v201_v7, %v104_v8  ;;  %v218_v10 = vpop.f32.mrb[1].mxu0 }
  0xdd   :  { %v108_v11 = vmax.f32 %v105_v9, 0.0 }
  0xdf   :  { %222 = vmatmul.mubr.msk.f32.vlgmr.msra.gmra.mrb[0].mxu1 %vm117_vm6, %v108_v11 }
 0x1b2   :  { %v191_v13 = vpop.f32.mrb[0].mxu1 }
 0x1b3   :  { %v192_v14 = vadd.f32 %v204_v12, %v191_v13  ;;  %v223_v15 = vpop.f32.mrb[1].mxu1 }
 0x1b5   :  { %196 = vst.msk [vmem:[%s292_s5] sm:$0xff] %vm195_vm7, %v192_v14 }

</bundles_post_ra>
